<compile_context>
chip_gen: v6e
topology: v6e:2x2x1
jax: 0.10.0
libtpu: 0.0.40
codegen_flags: <defaults>
</compile_context>

<pallas_src>
import functools

import jax
import jax.numpy as jnp
from jax.experimental import pallas as pl
from jax.experimental.pallas import tpu as pltpu


def _es_loss_kernel(p_ref, t_ref, edge_ref, bce_ref, *, c, use_weighted_bce):
    # p_ref, t_ref: (1, H, W) one image of pred / target (f32, VMEM).
    # edge_ref, bce_ref: (1, 1, 128) per-image partial sums (scalar broadcast).
    _, H, W = p_ref.shape

    p = p_ref[0]          # (H, W)
    t = t_ref[0]          # (H, W)

    rows = jax.lax.broadcasted_iota(jnp.int32, (H, W), 0)
    cols = jax.lax.broadcasted_iota(jnp.int32, (H, W), 1)
    has_up = rows > 0            # x[i-1, j] is in-bounds
    has_down = rows < H - 1      # x[i+1, j] is in-bounds
    has_left = cols > 0          # x[i, j-1] is in-bounds
    has_right = cols < W - 1     # x[i, j+1] is in-bounds

    def sobel_edge(x):
        # Shifted neighbours via XLU rolls + border masks; reproduces the
        # zero-padding semantics of F.conv2d(..., padding=1) exactly.
        up = jnp.where(has_up, pltpu.roll(x, 1, 0), 0.0)         # x[i-1, j]
        down = jnp.where(has_down, pltpu.roll(x, H - 1, 0), 0.0)  # x[i+1, j]
        s_v = up + 2.0 * x + down    # vertical smoothing  -> gx
        d_v = up - down              # vertical difference -> gy
        s_l = jnp.where(has_left, pltpu.roll(s_v, 1, 1), 0.0)        # s_v[i, j-1]
        s_r = jnp.where(has_right, pltpu.roll(s_v, W - 1, 1), 0.0)   # s_v[i, j+1]
        d_l = jnp.where(has_left, pltpu.roll(d_v, 1, 1), 0.0)
        d_r = jnp.where(has_right, pltpu.roll(d_v, W - 1, 1), 0.0)
        gx = s_l - s_r
        gy = d_l + 2.0 * d_v + d_r
        return jnp.sqrt(gx * gx + gy * gy + 1e-8)

    # Per-image partial sum of |edge_pred - edge_target|.
    edge_sum = jnp.sum(jnp.abs(sobel_edge(p) - sobel_edge(t)))

    # (Weighted) binary cross entropy; PyTorch clamps the log terms at -100.
    log_p = jnp.maximum(jnp.log(p), -100.0)
    log_1mp = jnp.maximum(jnp.log(1.0 - p), -100.0)
    bce = -(t * log_p + (1.0 - t) * log_1mp)
    if use_weighted_bce:
        bce = (t + c) * bce
    bce_sum = jnp.sum(bce)

    edge_ref[...] = jnp.full(edge_ref.shape, edge_sum, dtype=jnp.float32)
    bce_ref[...] = jnp.full(bce_ref.shape, bce_sum, dtype=jnp.float32)


def es_loss(pred, target, a=0.7, b=0.3, c=0.5, use_weighted_bce=True):
    """pred, target: (B, 1, H, W) float32, pred in (0, 1), target in [0, 1]."""
    B, C, H, W = pred.shape
    assert C == 1, "ESLoss Sobel buffers imply single-channel inputs"

    p = pred.reshape(B, H, W).astype(jnp.float32)
    t = target.reshape(B, H, W).astype(jnp.float32)

    kernel = functools.partial(
        _es_loss_kernel, c=c, use_weighted_bce=use_weighted_bce)

    n = B * H * W
    cost = pl.CostEstimate(
        flops=50 * n,                               # Sobel + BCE elementwise work
        transcendentals=4 * n,                      # 2 sqrt + 2 log per element
        bytes_accessed=2 * n * 4 + 2 * B * 128 * 4)  # deduped f32 inputs + tiny partials

    # Per-step VMEM need: 2 inputs x 2 pipeline buffers + f32 intermediates.
    vmem_limit = int(min(32 * 2**20, max(4 * 2**20, 24 * H * W * 4)))

    edge_part, bce_part = pl.pallas_call(
        kernel,
        grid=(B,),
        in_specs=[
            pl.BlockSpec((1, H, W), lambda bi: (bi, 0, 0)),
            pl.BlockSpec((1, H, W), lambda bi: (bi, 0, 0)),
        ],
        out_specs=[
            pl.BlockSpec((1, 1, 128), lambda bi: (bi, 0, 0)),
            pl.BlockSpec((1, 1, 128), lambda bi: (bi, 0, 0)),
        ],
        out_shape=[
            jax.ShapeDtypeStruct((B, 1, 128), jnp.float32),
            jax.ShapeDtypeStruct((B, 1, 128), jnp.float32),
        ],
        compiler_params=pltpu.CompilerParams(
            dimension_semantics=("parallel",),
            vmem_limit_bytes=vmem_limit),
        cost_estimate=cost,
    )(p, t)

    # Tiny epilogue: combine per-image (per-core) partial sums, single 1/N scale
    # and the a/b blend (exactly mean-of-all-elements like the PyTorch module).
    inv_n = 1.0 / n
    edge_loss = jnp.sum(edge_part[:, 0, 0]) * inv_n
    region_loss = jnp.sum(bce_part[:, 0, 0]) * inv_n
    return a * edge_loss + b * region_loss


def _es_loss_ref(pred, target, a=0.7, b=0.3, c=0.5, use_weighted_bce=True):
    """Pure-JAX reference (pad + shifted slices), mirrors the PyTorch module."""
    B, C, H, W = pred.shape
    p = pred.reshape(B, H, W).astype(jnp.float32)
    t = target.reshape(B, H, W).astype(jnp.float32)
    pp = jnp.pad(p, ((0, 0), (1, 1), (1, 1)))
    tp = jnp.pad(t, ((0, 0), (1, 1), (1, 1)))

    def sobel_edge(xpad):
        sl = lambda di, dj: xpad[:, di:di + H, dj:dj + W]
        gx = sl(0, 0) - sl(0, 2) + 2 * sl(1, 0) - 2 * sl(1, 2) + sl(2, 0) - sl(2, 2)
        gy = sl(0, 0) + 2 * sl(0, 1) + sl(0, 2) - sl(2, 0) - 2 * sl(2, 1) - sl(2, 2)
        return jnp.sqrt(gx * gx + gy * gy + 1e-8)

    edge_loss = jnp.mean(jnp.abs(sobel_edge(pp) - sobel_edge(tp)))
    log_p = jnp.maximum(jnp.log(p), -100.0)
    log_1mp = jnp.maximum(jnp.log(1.0 - p), -100.0)
    bce = -(t * log_p + (1.0 - t) * log_1mp)
    if use_weighted_bce:
        bce = (t + c) * bce
    region_loss = jnp.mean(bce)
    return a * edge_loss + b * region_loss


if __name__ == "__main__":
    key = jax.random.PRNGKey(0)
    k1, k2 = jax.random.split(key)
    B, C, H, W = 2, 1, 16, 16
    # pred must lie strictly in (0, 1) for BCE; target in [0, 1]
    pred = jax.nn.sigmoid(jax.random.normal(k1, (B, C, H, W), dtype=jnp.float32))
    target = jax.random.uniform(k2, (B, C, H, W), dtype=jnp.float32)

    loss = jax.block_until_ready(es_loss(pred, target))
    ref = jax.block_until_ready(_es_loss_ref(pred, target))
    assert jnp.allclose(loss, ref, rtol=1e-5, atol=1e-5), (loss, ref)

    print("KERNEL_OK")
</pallas_src>

<mosaic_0001>
module attributes {stable_mosaic.version = 11 : i64} {
  func.func @_es_loss_kernel(%arg0: i32, %arg1: memref<1x16x16xf32, #tpu.memory_space<vmem>>, %arg2: memref<1x16x16xf32, #tpu.memory_space<vmem>>, %arg3: memref<1x1x128xf32, #tpu.memory_space<vmem>>, %arg4: memref<1x1x128xf32, #tpu.memory_space<vmem>>) attributes {dimension_semantics = [#tpu.dimension_semantics<parallel>], iteration_bounds = array<i64: 2>, scalar_prefetch = 0 : i64, scratch_operands = 0 : i64, tpu.core_type = #tpu.core_type<tc>, window_params = [{transform_indices = @transform_0, window_bounds = array<i64: 1, 16, 16>}, {transform_indices = @transform_1, window_bounds = array<i64: 1, 16, 16>}, {transform_indices = @transform_2, window_bounds = array<i64: 1, 1, 128>}, {transform_indices = @transform_3, window_bounds = array<i64: 1, 1, 128>}]} {
    %c0 = arith.constant 0 : index
    %c0_0 = arith.constant 0 : index
    %c0_1 = arith.constant 0 : index
    %0 = vector.load %arg1[%c0, %c0_0, %c0_1] : memref<1x16x16xf32, #tpu.memory_space<vmem>>, vector<1x16x16xf32>
    %1 = vector.shape_cast %0 : vector<1x16x16xf32> to vector<16x16xf32>
    %c0_2 = arith.constant 0 : index
    %c0_3 = arith.constant 0 : index
    %c0_4 = arith.constant 0 : index
    %2 = vector.load %arg2[%c0_2, %c0_3, %c0_4] : memref<1x16x16xf32, #tpu.memory_space<vmem>>, vector<1x16x16xf32>
    %3 = vector.shape_cast %2 : vector<1x16x16xf32> to vector<16x16xf32>
    %4 = tpu.iota {dimensions = array<i32: 0>} : vector<16x16xi32>
    %5 = tpu.iota {dimensions = array<i32: 1>} : vector<16x16xi32>
    %c0_i32 = arith.constant 0 : i32
    %6 = vector.broadcast %c0_i32 : i32 to vector<16x16xi32>
    %7 = arith.cmpi sgt, %4, %6 : vector<16x16xi32>
    %c15_i32 = arith.constant 15 : i32
    %8 = vector.broadcast %c15_i32 : i32 to vector<16x16xi32>
    %9 = arith.cmpi slt, %4, %8 : vector<16x16xi32>
    %c0_i32_5 = arith.constant 0 : i32
    %10 = vector.broadcast %c0_i32_5 : i32 to vector<16x16xi32>
    %11 = arith.cmpi sgt, %5, %10 : vector<16x16xi32>
    %c15_i32_6 = arith.constant 15 : i32
    %12 = vector.broadcast %c15_i32_6 : i32 to vector<16x16xi32>
    %13 = arith.cmpi slt, %5, %12 : vector<16x16xi32>
    %c1_i32 = arith.constant 1 : i32
    %14 = tpu.dynamic_rotate %1 by %c1_i32 dim 0 : vector<16x16xf32>, i32 -> vector<16x16xf32>
    %cst = arith.constant 0.000000e+00 : f32
    %15 = vector.broadcast %cst : f32 to vector<16x16xf32>
    %16 = arith.select %7, %14, %15 : vector<16x16xi1>, vector<16x16xf32>
    %c15_i32_7 = arith.constant 15 : i32
    %17 = tpu.dynamic_rotate %1 by %c15_i32_7 dim 0 : vector<16x16xf32>, i32 -> vector<16x16xf32>
    %cst_8 = arith.constant 0.000000e+00 : f32
    %18 = vector.broadcast %cst_8 : f32 to vector<16x16xf32>
    %19 = arith.select %9, %17, %18 : vector<16x16xi1>, vector<16x16xf32>
    %cst_9 = arith.constant 2.000000e+00 : f32
    %20 = vector.broadcast %cst_9 : f32 to vector<16x16xf32>
    %21 = arith.mulf %20, %1 : vector<16x16xf32>
    %22 = arith.addf %16, %21 : vector<16x16xf32>
    %23 = arith.addf %22, %19 : vector<16x16xf32>
    %24 = arith.subf %16, %19 : vector<16x16xf32>
    %c1_i32_10 = arith.constant 1 : i32
    %25 = tpu.dynamic_rotate %23 by %c1_i32_10 dim 1 : vector<16x16xf32>, i32 -> vector<16x16xf32>
    %cst_11 = arith.constant 0.000000e+00 : f32
    %26 = vector.broadcast %cst_11 : f32 to vector<16x16xf32>
    %27 = arith.select %11, %25, %26 : vector<16x16xi1>, vector<16x16xf32>
    %c15_i32_12 = arith.constant 15 : i32
    %28 = tpu.dynamic_rotate %23 by %c15_i32_12 dim 1 : vector<16x16xf32>, i32 -> vector<16x16xf32>
    %cst_13 = arith.constant 0.000000e+00 : f32
    %29 = vector.broadcast %cst_13 : f32 to vector<16x16xf32>
    %30 = arith.select %13, %28, %29 : vector<16x16xi1>, vector<16x16xf32>
    %c1_i32_14 = arith.constant 1 : i32
    %31 = tpu.dynamic_rotate %24 by %c1_i32_14 dim 1 : vector<16x16xf32>, i32 -> vector<16x16xf32>
    %cst_15 = arith.constant 0.000000e+00 : f32
    %32 = vector.broadcast %cst_15 : f32 to vector<16x16xf32>
    %33 = arith.select %11, %31, %32 : vector<16x16xi1>, vector<16x16xf32>
    %c15_i32_16 = arith.constant 15 : i32
    %34 = tpu.dynamic_rotate %24 by %c15_i32_16 dim 1 : vector<16x16xf32>, i32 -> vector<16x16xf32>
    %cst_17 = arith.constant 0.000000e+00 : f32
    %35 = vector.broadcast %cst_17 : f32 to vector<16x16xf32>
    %36 = arith.select %13, %34, %35 : vector<16x16xi1>, vector<16x16xf32>
    %37 = arith.subf %27, %30 : vector<16x16xf32>
    %cst_18 = arith.constant 2.000000e+00 : f32
    %38 = vector.broadcast %cst_18 : f32 to vector<16x16xf32>
    %39 = arith.mulf %38, %24 : vector<16x16xf32>
    %40 = arith.addf %33, %39 : vector<16x16xf32>
    %41 = arith.addf %40, %36 : vector<16x16xf32>
    %42 = arith.mulf %37, %37 : vector<16x16xf32>
    %43 = arith.mulf %41, %41 : vector<16x16xf32>
    %44 = arith.addf %42, %43 : vector<16x16xf32>
    %cst_19 = arith.constant 9.99999993E-9 : f32
    %45 = vector.broadcast %cst_19 : f32 to vector<16x16xf32>
    %46 = arith.addf %44, %45 : vector<16x16xf32>
    %47 = math.sqrt %46 : vector<16x16xf32>
    %c1_i32_20 = arith.constant 1 : i32
    %48 = tpu.dynamic_rotate %3 by %c1_i32_20 dim 0 : vector<16x16xf32>, i32 -> vector<16x16xf32>
    %cst_21 = arith.constant 0.000000e+00 : f32
    %49 = vector.broadcast %cst_21 : f32 to vector<16x16xf32>
    %50 = arith.select %7, %48, %49 : vector<16x16xi1>, vector<16x16xf32>
    %c15_i32_22 = arith.constant 15 : i32
    %51 = tpu.dynamic_rotate %3 by %c15_i32_22 dim 0 : vector<16x16xf32>, i32 -> vector<16x16xf32>
    %cst_23 = arith.constant 0.000000e+00 : f32
    %52 = vector.broadcast %cst_23 : f32 to vector<16x16xf32>
    %53 = arith.select %9, %51, %52 : vector<16x16xi1>, vector<16x16xf32>
    %cst_24 = arith.constant 2.000000e+00 : f32
    %54 = vector.broadcast %cst_24 : f32 to vector<16x16xf32>
    %55 = arith.mulf %54, %3 : vector<16x16xf32>
    %56 = arith.addf %50, %55 : vector<16x16xf32>
    %57 = arith.addf %56, %53 : vector<16x16xf32>
    %58 = arith.subf %50, %53 : vector<16x16xf32>
    %c1_i32_25 = arith.constant 1 : i32
    %59 = tpu.dynamic_rotate %57 by %c1_i32_25 dim 1 : vector<16x16xf32>, i32 -> vector<16x16xf32>
    %cst_26 = arith.constant 0.000000e+00 : f32
    %60 = vector.broadcast %cst_26 : f32 to vector<16x16xf32>
    %61 = arith.select %11, %59, %60 : vector<16x16xi1>, vector<16x16xf32>
    %c15_i32_27 = arith.constant 15 : i32
    %62 = tpu.dynamic_rotate %57 by %c15_i32_27 dim 1 : vector<16x16xf32>, i32 -> vector<16x16xf32>
    %cst_28 = arith.constant 0.000000e+00 : f32
    %63 = vector.broadcast %cst_28 : f32 to vector<16x16xf32>
    %64 = arith.select %13, %62, %63 : vector<16x16xi1>, vector<16x16xf32>
    %c1_i32_29 = arith.constant 1 : i32
    %65 = tpu.dynamic_rotate %58 by %c1_i32_29 dim 1 : vector<16x16xf32>, i32 -> vector<16x16xf32>
    %cst_30 = arith.constant 0.000000e+00 : f32
    %66 = vector.broadcast %cst_30 : f32 to vector<16x16xf32>
    %67 = arith.select %11, %65, %66 : vector<16x16xi1>, vector<16x16xf32>
    %c15_i32_31 = arith.constant 15 : i32
    %68 = tpu.dynamic_rotate %58 by %c15_i32_31 dim 1 : vector<16x16xf32>, i32 -> vector<16x16xf32>
    %cst_32 = arith.constant 0.000000e+00 : f32
    %69 = vector.broadcast %cst_32 : f32 to vector<16x16xf32>
    %70 = arith.select %13, %68, %69 : vector<16x16xi1>, vector<16x16xf32>
    %71 = arith.subf %61, %64 : vector<16x16xf32>
    %cst_33 = arith.constant 2.000000e+00 : f32
    %72 = vector.broadcast %cst_33 : f32 to vector<16x16xf32>
    %73 = arith.mulf %72, %58 : vector<16x16xf32>
    %74 = arith.addf %67, %73 : vector<16x16xf32>
    %75 = arith.addf %74, %70 : vector<16x16xf32>
    %76 = arith.mulf %71, %71 : vector<16x16xf32>
    %77 = arith.mulf %75, %75 : vector<16x16xf32>
    %78 = arith.addf %76, %77 : vector<16x16xf32>
    %cst_34 = arith.constant 9.99999993E-9 : f32
    %79 = vector.broadcast %cst_34 : f32 to vector<16x16xf32>
    %80 = arith.addf %78, %79 : vector<16x16xf32>
    %81 = math.sqrt %80 : vector<16x16xf32>
    %82 = arith.subf %47, %81 : vector<16x16xf32>
    %83 = math.absf %82 : vector<16x16xf32>
    %84 = vector.shape_cast %83 : vector<16x16xf32> to vector<1x16x16xf32>
    %cst_35 = arith.constant dense<0.000000e+00> : vector<1xf32>
    %85 = vector.multi_reduction <add>, %84, %cst_35 [1, 2] : vector<1x16x16xf32> to vector<1xf32>
    %86 = vector.shape_cast %85 : vector<1xf32> to vector<1x1x1xf32>
    %87 = vector.extract %86[0, 0, 0] : f32 from vector<1x1x1xf32>
    %88 = math.log %1 : vector<16x16xf32>
    %cst_36 = arith.constant -1.000000e+02 : f32
    %89 = vector.broadcast %cst_36 : f32 to vector<16x16xf32>
    %90 = arith.maximumf %88, %89 : vector<16x16xf32>
    %cst_37 = arith.constant 1.000000e+00 : f32
    %91 = vector.broadcast %cst_37 : f32 to vector<16x16xf32>
    %92 = arith.subf %91, %1 : vector<16x16xf32>
    %93 = math.log %92 : vector<16x16xf32>
    %cst_38 = arith.constant -1.000000e+02 : f32
    %94 = vector.broadcast %cst_38 : f32 to vector<16x16xf32>
    %95 = arith.maximumf %93, %94 : vector<16x16xf32>
    %96 = arith.mulf %3, %90 : vector<16x16xf32>
    %cst_39 = arith.constant 1.000000e+00 : f32
    %97 = vector.broadcast %cst_39 : f32 to vector<16x16xf32>
    %98 = arith.subf %97, %3 : vector<16x16xf32>
    %99 = arith.mulf %98, %95 : vector<16x16xf32>
    %100 = arith.addf %96, %99 : vector<16x16xf32>
    %cst_40 = arith.constant 0.000000e+00 : f32
    %101 = vector.broadcast %cst_40 : f32 to vector<16x16xf32>
    %102 = arith.subf %101, %100 : vector<16x16xf32>
    %cst_41 = arith.constant 5.000000e-01 : f32
    %103 = vector.broadcast %cst_41 : f32 to vector<16x16xf32>
    %104 = arith.addf %3, %103 : vector<16x16xf32>
    %105 = arith.mulf %104, %102 : vector<16x16xf32>
    %106 = vector.shape_cast %105 : vector<16x16xf32> to vector<1x16x16xf32>
    %cst_42 = arith.constant dense<0.000000e+00> : vector<1xf32>
    %107 = vector.multi_reduction <add>, %106, %cst_42 [1, 2] : vector<1x16x16xf32> to vector<1xf32>
    %108 = vector.shape_cast %107 : vector<1xf32> to vector<1x1x1xf32>
    %109 = vector.extract %108[0, 0, 0] : f32 from vector<1x1x1xf32>
    %110 = vector.broadcast %87 : f32 to vector<1x1x128xf32>
    %c0_43 = arith.constant 0 : index
    %c0_44 = arith.constant 0 : index
    %c0_45 = arith.constant 0 : index
    %111 = vector.load %arg3[%c0_43, %c0_44, %c0_45] : memref<1x1x128xf32, #tpu.memory_space<vmem>>, vector<1x1x128xf32>
    tpu.vector_store %arg3[%c0_43, %c0_44, %c0_45], %110 {strides = array<i32>} : memref<1x1x128xf32, #tpu.memory_space<vmem>>, vector<1x1x128xf32>,
    %112 = vector.broadcast %109 : f32 to vector<1x1x128xf32>
    %c0_46 = arith.constant 0 : index
    %c0_47 = arith.constant 0 : index
    %c0_48 = arith.constant 0 : index
    %113 = vector.load %arg4[%c0_46, %c0_47, %c0_48] : memref<1x1x128xf32, #tpu.memory_space<vmem>>, vector<1x1x128xf32>
    tpu.vector_store %arg4[%c0_46, %c0_47, %c0_48], %112 {strides = array<i32>} : memref<1x1x128xf32, #tpu.memory_space<vmem>>, vector<1x1x128xf32>,
    return
  }
  func.func @transform_0(%arg0: i32) -> (i32, i32, i32) {
    %c0_i32 = arith.constant 0 : i32
    %c0_i32_0 = arith.constant 0 : i32
    %c0_i32_1 = arith.constant 0 : i32
    return %arg0, %c0_i32, %c0_i32_0 : i32, i32, i32
  }
  func.func @transform_1(%arg0: i32) -> (i32, i32, i32) {
    %c0_i32 = arith.constant 0 : i32
    %c0_i32_0 = arith.constant 0 : i32
    %c0_i32_1 = arith.constant 0 : i32
    return %arg0, %c0_i32, %c0_i32_0 : i32, i32, i32
  }
  func.func @transform_2(%arg0: i32) -> (i32, i32, i32) {
    %c0_i32 = arith.constant 0 : i32
    %c0_i32_0 = arith.constant 0 : i32
    %c0_i32_1 = arith.constant 0 : i32
    return %arg0, %c0_i32, %c0_i32_0 : i32, i32, i32
  }
  func.func @transform_3(%arg0: i32) -> (i32, i32, i32) {
    %c0_i32 = arith.constant 0 : i32
    %c0_i32_0 = arith.constant 0 : i32
    %c0_i32_1 = arith.constant 0 : i32
    return %arg0, %c0_i32, %c0_i32_0 : i32, i32, i32
  }
}

</mosaic_0001>

<bundles_post_ra>
// kernel: tpu_custom_call.1
= control target key start
LH: loop header
LB: loop body
LE: loop exit
PB: predicated region body
PF: predicated region fallthrough
CT: control target
= control target key end

     0   :  { %9 = vsyncpa [#allocation3], 0  ;;  %s1342_s0 = inlined_call_operand.hbm [shape: f32[2,16,16], index: 0, kind: input, shape index: {}]   ;;  %s1343_s1 = inlined_call_operand.hbm [shape: f32[2,16,16], index: 1, kind: input, shape index: {}]   ;;  %s1344_s2 = inlined_call_operand.hbm [shape: f32[2,1,128], index: 2, kind: output, shape index: {0}]   ;;  %s1345_s3 = inlined_call_operand.hbm [shape: f32[2,1,128], index: 3, kind: output, shape index: {1}]  }
   0x1   :  { %11 = vsyncpa [#allocation3 + $0x1], 0 }
   0x2   :  { %12 = vsyncpa [#allocation6], 0 }
   0x3   :  { %14 = vsyncpa [#allocation6 + $0x1], 0 }
   0x4   :  { %15 = vsyncpa [#allocation4], 0 }
   0x5   :  { %17 = vsyncpa [#allocation4 + $0x1], 0 }
   0x6   :  { %18 = vsyncpa [#allocation9], 0 }
   0x7   :  { %20 = vsyncpa [#allocation9 + $0x1], 0  ;;  %s968_s12 = smov 0   ;;  %s970_s13 = smov 0  }
   0x8   :  { %s972_s14 = smov 0   ;;  %s974_s15 = smov 0  }
   0x9 LB: > { %s989_s16 = sadd.s32 4294967295, %s937_s15   ;;  %s684_s17 = sadd.s32 4294967294, %s937_s15   ;;  %s937_s15 = sphi %s974_s15, %s1361_s15   ;;  %s933_s14 = sphi %s972_s14, %s1360_s14   ;;  %s929_s13 = sphi %s970_s13, %s1359_s13   ;;  %s925_s12 = sphi %s968_s12, %s1358_s12  }
   0xa   : > { %s993_s18 = sadd.s32 1, %s937_s15   ;;  %s33_s19 = sadd.s32 1, %s933_s14 }
   0xb   : > { %s30_s20 = ssub.s32 %s937_s15, %s993_s18  ;;  %p40_p0 = scmp.ne.s32.totalorder %s933_s14, %s929_s13 }
   0xc   : > { %p31_p1 = scmp.eq.s32.totalorder %s30_s20, 0  ;;  %p41_p2 = scmp.eq.s32.totalorder %s937_s15, 0 }
   0xd   : > { %p46_p3 = scmp.ne.s32.totalorder %s929_s13, %s925_s12  ;;  %p47_p4 = scmp.eq.s32.totalorder %s989_s16, 0 }
   0xe   : > { %s1005_s21 = scalar_select %p31_p1, %s933_s14, %s33_s19  }
   0xf   : > { %p1007_p5 = por %p41_p2, %p40_p0  ;;  %p1011_p6 = por %p47_p4, %p46_p3 }
  0x10   : > { %p96_p7 = scmp.eq.s32.totalorder %s989_s16, 1  ;;  %p102_p8 = scmp.eq.s32.totalorder %s684_s17, 1 }
  0x11   : > { %s1349_s23 = scalar_select %p1011_p6, 1, 0 }
  0x12   : > { %p728_p10 = scmp.lt.s32.totalorder %s937_s15, 2  ;;  %p1018_p11 = por %p96_p7, %p40_p0 }
  0x13   : > { %p1022_p12 = por %p102_p8, %p46_p3  ;;  %s1027_s26 = sand.u32 1, %s933_s14  }
  0x14   : > { %s1350_s24 = scalar_select %p1018_p11, 1, 0 }
  0x15   : > { %s1351_s25 = scalar_select %p1022_p12, 1, 0 }
  0x16   : > { %s700_s27 = sshll.u32 %s937_s15, 8  ;;  %s687_s28 = sshll.u32 %s1027_s26, 4 }
  0x17   : > { %s1036_s4 = scalar_lea.hbm %s1342_s0, %s700_s27  ;;  %s152_s5 = scalar_lea.vmem [#allocation2], %s687_s28 }
  0x18   : > { %s159_s6 = sshll.u32 %s152_s5, 4  ;;  %p1042_p13 = pnand %p728_p10, %p1007_p5  ;;  %s1046_s6 = int_to_ptr.vmem [resolvable:$true] %s159_s6 }
  0x19   : > { %s149_s8 = scalar_lea.sflag [#allocation3], %s1027_s26  ;;  %s783_s9 = scalar_lea.hbm %s1036_s4, 256 }
  0x1a   : > { %p784_p0 = scmp.ne.s32.totalorder %s1036_s4, %s783_s9  ;;  %p785_p1 = pneg %p1042_p13 }
  0x1b   : > { %s788_s17 = scalar_lea.hbm %s1342_s0, 512  ;;  %p789_p4 = scmp.lt.s32.totalorder %s1036_s4, %s1342_s0 }
  0x1c   : > { %p786_p2 = pnand %p785_p1, %p784_p0  ;;  %p790_p5 = scmp.lt.s32.totalorder %s788_s17, %s783_s9 }
  0x1e   : > { %p787_p3 = pneg %p786_p2  ;;  %p791_p7 = por %p790_p5, %p789_p4 }
  0x20   : > { %p792_p8 = pnand %p791_p7, %p787_p3 }
  0x22   : > { %795 = shalt.err (!%p792_p8)
}
  0x23   : > { %s796_s22 = scalar_lea.vmem %s1046_s6, 256  ;;  %s939_s29 = smov [#allocation2]  }
  0x24   : > { %p797_p10 = scmp.ne.s32.totalorder %s1046_s6, %s796_s22  ;;  %s801_s30 = sshll.u32 %s939_s29, 4  ;;  %s802_s30 = int_to_ptr.vmem [resolvable:$false] %s801_s30 }
  0x25   : > { %s803_s5 = scalar_lea.vmem %s802_s30, 512  ;;  %p804_p9 = scmp.lt.s32.totalorder %s1046_s6, %s802_s30 }
  0x26   : > { %p799_p0 = pnand %p797_p10, %p785_p1  ;;  %p805_p12 = scmp.lt.s32.totalorder %s803_s5, %s796_s22 }
  0x28   : > { %p800_p2 = pneg %p799_p0  ;;  %p806_p11 = por %p805_p12, %p804_p9 }
  0x2a   : > { %p807_p4 = pnand %p806_p11, %p800_p2 }
  0x2c   : > { %810 = shalt.err (!%p807_p4)
}
  0x2d   : > { %s940_s9 = smov 128   ;;  %s941_s10 = smov 8  }
  0x2e   : > { %717 = dma.hbm_to_vmem [thread:$0]  (!%p1042_p13), %s1036_s4, 256, %s1046_s6, %s149_s8, %s940_s9, %s940_s9, %s941_s10  }
  0x2f   : > { %p693_p9 = scmp.ge.s32.totalorder %s937_s15, 1  ;;  %p188_p11 = scmp.lt.s32.totalorder %s937_s15, 3 }
  0x30   : > { %s1089_s20 = scalar_lea.hbm %s1343_s1, %s700_s27  ;;  %s173_s22 = scalar_lea.vmem [#allocation5], %s687_s28 }
  0x31   : > { %p1080_p12 = pnand %p693_p9, %p188_p11  ;;  %s180_s29 = sshll.u32 %s173_s22, 4  ;;  %s1093_s29 = int_to_ptr.vmem [resolvable:$true] %s180_s29 }
  0x32   : > { %s170_s4 = scalar_lea.sflag [#allocation6], %s1027_s26  ;;  %s811_s6 = scalar_lea.hbm %s1089_s20, 256 }
  0x33   : > { %p812_p3 = scmp.ne.s32.totalorder %s1089_s20, %s811_s6  ;;  %s816_s27 = scalar_lea.hbm %s1343_s1, 512 }
  0x34   : > { %p817_p8 = scmp.lt.s32.totalorder %s1089_s20, %s1343_s1  ;;  %p818_p10 = scmp.lt.s32.totalorder %s816_s27, %s811_s6 }
  0x35   : > { %p814_p5 = pnand %p812_p3, %p785_p1 }
  0x36   : > { %p819_p0 = por %p818_p10, %p817_p8 }
  0x37   : > { %p815_p7 = pneg %p814_p5 }
  0x39   : > { %p820_p2 = pnand %p819_p0, %p815_p7 }
  0x3b   : > { %823 = shalt.err (!%p820_p2)
}
  0x3c   : > { %s824_s26 = scalar_lea.vmem %s1093_s29, 256  ;;  %s942_s28 = smov [#allocation5]  }
  0x3d   : > { %p825_p4 = scmp.ne.s32.totalorder %s1093_s29, %s824_s26  ;;  %s829_s19 = sshll.u32 %s942_s28, 4  ;;  %s830_s19 = int_to_ptr.vmem [resolvable:$false] %s829_s19 }
  0x3e   : > { %s831_s22 = scalar_lea.vmem %s830_s19, 512  ;;  %p832_p3 = scmp.lt.s32.totalorder %s1093_s29, %s830_s19 }
  0x3f   : > { %p827_p9 = pnand %p825_p4, %p785_p1  ;;  %p833_p5 = scmp.lt.s32.totalorder %s831_s22, %s824_s26 }
  0x41   : > { %p828_p11 = pneg %p827_p9  ;;  %p834_p6 = por %p833_p5, %p832_p3 }
  0x43   : > { %p835_p8 = pnand %p834_p6, %p828_p11 }
  0x45   : > { %838 = shalt.err (!%p835_p8)
}
  0x46   : > { %720 = dma.hbm_to_vmem [thread:$0]  (!%p1042_p13), %s1089_s20, 256, %s1093_s29, %s170_s4, %s940_s9, %s940_s9, %s941_s10  }
  0x47   : > { %192 = sbr.rel (%p1080_p12) target bundleno = 738 (0x2e2), region = 28  ;;  %s1124_s6 = sand.u32 (!%p1080_p12), 1, %s929_s13  }
  0x48   : > { %s694_s8 = sshll.u32 (!%p1080_p12), %s1124_s6, 4  ;;  %s195_s30 = scalar_lea.sflag (!%p1080_p12), [#allocation3], %s1124_s6 }
  0x49   : > { %s198_s27 = scalar_lea.vmem (!%p1080_p12), [#allocation2], %s694_s8  ;;  %p1354_p6 = scmp.ne.s32.totalorder (!%p1080_p12), %s1349_s23, 0 }
  0x4c   : > { %908 = dma.done.wait (%p1354_p6), %s195_s30, 256  }
  0x4d   : > { %910 = vsyncadd (%p1354_p6), %s195_s30, 4294967040  ;;  %s204_s7 = scalar_lea.sflag [#allocation6], %s1124_s6  ;;  %s207_s9 = scalar_lea.vmem [#allocation5], %s694_s8 }
  0x4e   : > { %912 = dma.done.wait (%p1354_p6), %s204_s7, 256  }
  0x4f   : > { %914 = vsyncadd (%p1354_p6), %s204_s7, 4294967040  ;;  %v242_v0 = vlaneseq  ;;  %v1138_v3 = vld [vmem:[%s198_s27] sm:$0xff]  ;;  %v1140_v4 = vld [vmem:[%s198_s27 + $0x8] sm:$0xff]  ;;  %s943_s23 = smov 16   ;;  %vm275_vm4 = vcmask 1047680   ;;  %s944_s10 = smov 113  }
  0x50   : > { %v1142_v5 = vld [vmem:[%s207_s9] sm:$0xff]  ;;  %v253_v6 = vrot.slane %v1138_v3, 7  ;;  %v254_v7 = vrot.slane %v1140_v4, 7  ;;  %v260_v8 = vrot.slane %v1138_v3, 1  ;;  %v261_v9 = vrot.slane %v1140_v4, 1  ;;  %v1148_v10 = vld [vmem:[%s207_s9 + $0x8] sm:$0xff] }
  0x51   : > { %v243_v1 = vshrl.u32 %v242_v0, 7  ;;  %v366_v11 = vrot.slane %v1142_v5, 7  ;;  %v367_v12 = vrot.slane %v1148_v10, 7  ;;  %v372_v13 = vrot.slane %v1142_v5, 1  ;;  %s945_s11 = smov 127   ;;  %s237_s20 = scalar_lea.vmem [#allocation8], %s1124_s6 }
  0x52   : > { %v373_v14 = vrot.slane %v1148_v10, 1  ;;  %v267_v28 = vmul.f32 2.0, %v1138_v3  ;;  %v268_v29 = vmul.f32 2.0, %v1140_v4  ;;  %v378_v32 = vmul.f32 2.0, %v1142_v5  ;;  %s567_s29 = sshll.u32 %s237_s20, 4  ;;  %s696_s4 = sshll.u32 %s989_s16, 4  ;;  %s1268_s29 = int_to_ptr.vmem [resolvable:$true] %s567_s29 }
  0x53   : > { %v244_v2 = vadd.s32 8, %v243_v1  ;;  %vm247_vm0 = vcmp.gt.s32.totalorder %v243_v1, 0  ;;  %vm255_vm1 = vcmp.lt.s32.totalorder %v243_v1, 1  ;;  %vm262_vm2 = vcmp.lt.s32.totalorder %v243_v1, 7  ;;  %s231_s5 = scalar_lea.vmem [#allocation7], %s1124_s6  ;;  %s1273_s19 = scalar_lea.hbm %s1344_s2, %s696_s4 }
  0x54   : > { %v257_v15 = vsel %vm255_vm1, %v254_v7, %v253_v6  ;;  %v263_v16 = vsel %vm262_vm2, %v260_v8, %v261_v9  ;;  %v256_v17 = vsel %vm255_vm1, %v253_v6, %v254_v7  ;;  %v264_v18 = vsel %vm262_vm2, %v261_v9, %v260_v8  ;;  %s554_s17 = sshll.u32 %s231_s5, 4  ;;  %s1280_s27 = scalar_lea.hbm %s1345_s3, %s696_s4  ;;  %s1275_s17 = int_to_ptr.vmem [resolvable:$true] %s554_s17 }
  0x55   : > { %vm250_vm3 = vcmp.lt.s32.totalorder %v244_v2, 15  ;;  %v258_v19 = vsel %vm247_vm0, %v257_v15, 0.0  ;;  %v369_v20 = vsel %vm255_vm1, %v367_v12, %v366_v11  ;;  %v374_v21 = vsel %vm262_vm2, %v372_v13, %v373_v14  ;;  %s538_s7 = scalar_lea.sflag [#allocation4], %s1124_s6  ;;  %s839_s9 = scalar_lea.vmem %s1275_s17, 16 }
  0x56   : > { %v266_v22 = vsel %vm250_vm3, %v264_v18, 0.0  ;;  %v1162_v23 = vsub.f32 %v258_v19, %v263_v16  ;;  %v370_v24 = vsel %vm247_vm0, %v369_v20, 0.0  ;;  %v368_v25 = vsel %vm255_vm1, %v366_v11, %v367_v12  ;;  %p840_p13 = scmp.ne.s32.totalorder %s1275_s17, %s839_s9  ;;  %p1355_p1 = scmp.ne.s32.totalorder %s1350_s24, 0 }
  0x57   : > { %v1166_v26 = vsub.f32 %v370_v24, %v374_v21  ;;  %v375_v27 = vsel %vm262_vm2, %v373_v14, %v372_v13  ;;  %v1173_v30 = vsub.f32 %v256_v17, %v266_v22  ;;  %v269_v34 = vadd.f32 %v267_v28, %v258_v19 }
  0x58   : > { %306 = vrot.lane.b32.xlu0 %v1162_v23, %s943_s23  ;;  %v377_v31 = vsel %vm250_vm3, %v375_v27, 0.0  ;;  %v270_v35 = vadd.f32 %v268_v29, %v256_v17  ;;  %v379_v36 = vmul.f32 2.0, %v1148_v10  ;;  %v380_v38 = vadd.f32 %v378_v32, %v370_v24  ;;  %p841_p12 = pnand %p840_p13, %p1355_p1 }
  0x59   : > { %416 = vrot.lane.b32.xlu1 %v1166_v26, %s943_s23  ;;  %v1179_v33 = vsub.f32 %v368_v25, %v377_v31  ;;  %v271_v37 = vadd.f32 %v269_v34, %v263_v16  ;;  %v499_v13 = vsub.f32 1.0, %v1138_v3  ;;  %v500_v15 = vsub.f32 1.0, %v1140_v4 }
  0x5a   : > { %v272_v39 = vadd.f32 %v270_v35, %v266_v22  ;;  %v381_v40 = vadd.f32 %v379_v36, %v368_v25  ;;  %v382_v41 = vadd.f32 %v380_v38, %v374_v21  ;;  %767 = vlog2.f32 %v1138_v3  ;;  %p842_p7 = pneg %p841_p12 }
  0x5b   : > { %769 = vlog2.f32 %v1140_v4  ;;  %v509_v25 = vsub.f32 1.0, %v1142_v5  ;;  %v510_v27 = vsub.f32 1.0, %v1148_v10  ;;  %vm480_vm5 = vcmask 130048  }
  0x5c   : > { %309 = vrot.lane.b32.xlu0 %v1173_v30, %s943_s23  ;;  %v383_v42 = vadd.f32 %v381_v40, %v377_v31  ;;  %771 = vlog2.f32 %v499_v13 }
  0x5d   : > { %419 = vrot.lane.b32.xlu1 %v1179_v33, %s943_s23  ;;  %773 = vlog2.f32 %v500_v15 }
  0x60   : > { %276 = vrot.lane.b32.xlu0 %v271_v37, %s943_s23 }
  0x61   : > { %279 = vrot.lane.b32.xlu1 %v272_v39, %s943_s23 }
  0x64   : > { %386 = vrot.lane.b32.xlu0 %v382_v41, %s943_s23 }
  0x65   : > { %389 = vrot.lane.b32.xlu1 %v383_v42, %s943_s23 }
  0x67   : > { %v768_v18 = vpop.eup %767 }
  0x68   : > { %v770_v19 = vpop.eup %769  ;;  %v494_v3 = vmul.f32 0.6931472, %v768_v18 }
  0x69   : > { %v772_v20 = vpop.eup %771  ;;  %v496_v22 = vmul.f32 0.6931472, %v770_v19 }
  0x6a   : > { %v774_v21 = vpop.eup %773  ;;  %v502_v4 = vmul.f32 0.6931472, %v772_v20  ;;  %v497_v28 = vmax.f32 %v494_v3, -100.0 }
  0x6b   : > { %v504_v24 = vmul.f32 0.6931472, %v774_v21  ;;  %v498_v29 = vmax.f32 %v496_v22, -100.0 }
  0x6c   : > { %v505_v31 = vmax.f32 %v502_v4, -100.0  ;;  %v507_v34 = vmul.f32 %v497_v28, %v1142_v5  ;;  %v449_v4 = vmul.f32 2.0, %v1179_v33 }
  0x6d   : > { %v506_v32 = vmax.f32 %v504_v24, -100.0  ;;  %v508_v35 = vmul.f32 %v498_v29, %v1148_v10 }
  0x6e   : > { %v511_v36 = vmul.f32 %v509_v25, %v505_v31 }
  0x70   : > { %v513_v38 = vadd.f32 %v511_v36, %v507_v34 }
  0x72   : > { %v515_v40 = vsub.f32 0.0, %v513_v38 }
  0xca   : > { %v307_v43 = vpop.permute.xlu0 %306 }
  0xcb   : > { %v308_v44 = vsel %vm275_vm4, %v307_v43, %v1162_v23  ;;  %v417_v45 = vpop.permute.xlu1 %416  ;;  %v518_v43 = vadd.f32 0.5, %v1148_v10 }
  0xcc   : > { %312 = vrot.lane.b32.xlu0 %v308_v44, %s943_s23  ;;  %v418_v46 = vsel %vm275_vm4, %v417_v45, %v1166_v26 }
  0xce   : > { %v310_v47 = vpop.permute.xlu0 %309 }
  0xcf   : > { %v311_v48 = vsel %vm275_vm4, %v310_v47, %v1173_v30  ;;  %v420_v49 = vpop.permute.xlu1 %419 }
  0xd0   : > { %422 = vrot.lane.b32.xlu0 %v418_v46, %s943_s23  ;;  %314 = vrot.lane.b32.xlu1 %v311_v48, %s943_s23  ;;  %v421_v50 = vsel %vm275_vm4, %v420_v49, %v1179_v33 }
  0xd2   : > { %v277_v51 = vpop.permute.xlu0 %276 }
  0xd3   : > { %v278_v52 = vsel %vm275_vm4, %v277_v51, %v271_v37  ;;  %v280_v53 = vpop.permute.xlu1 %279 }
  0xd4   : > { %424 = vrot.lane.b32.xlu1 %v421_v50, %s943_s23  ;;  %282 = vrot.lane.b32.xlu0 %v278_v52, %s943_s23  ;;  %v281_v54 = vsel %vm275_vm4, %v280_v53, %v272_v39  ;;  %v246_v52 = vand.u32 127, %v242_v0 }
  0xd6   : > { %v387_v55 = vpop.permute.xlu0 %386  ;;  %vm251_vm6 = vcmp.gt.s32.totalorder %v246_v52, 0  ;;  %vm252_vm7 = vcmp.lt.s32.totalorder %v246_v52, 15 }
  0xd7   : > { %v388_v56 = vsel %vm275_vm4, %v387_v55, %v382_v41  ;;  %v390_v57 = vpop.permute.xlu1 %389 }
  0xd8   : > { %284 = vrot.lane.b32.xlu1 %v281_v54, %s943_s23  ;;  %392 = vrot.lane.b32.xlu0 %v388_v56, %s943_s23  ;;  %v391_v58 = vsel %vm275_vm4, %v390_v57, %v383_v42 }
  0xdc   : > { %394 = vrot.lane.b32.xlu1 %v391_v58, %s943_s23  ;;  %s946_s23 = smov [#allocation7]  }
 0x13e   : > { %v313_v59 = vpop.permute.xlu0 %312 }
 0x13f   : > { %v316_v60 = vsel %vm275_vm4, %v313_v59, %v1162_v23 }
 0x140   : > { %320 = vrot.lane.b32.xlu0 %v316_v60, %s944_s10 }
 0x142   : > { %v423_v61 = vpop.permute.xlu0 %422  ;;  %v315_v62 = vpop.permute.xlu1 %314 }
 0x143   : > { %v426_v63 = vsel %vm275_vm4, %v423_v61, %v1166_v26  ;;  %v317_v1 = vsel %vm275_vm4, %v315_v62, %v1173_v30 }
 0x144   : > { %430 = vrot.lane.b32.xlu0 %v426_v63, %s944_s10  ;;  %322 = vrot.lane.b32.xlu1 %v317_v1, %s944_s10 }
 0x146   : > { %v425_v2 = vpop.permute.xlu1 %424  ;;  %v283_v6 = vpop.permute.xlu0 %282 }
 0x147   : > { %v427_v7 = vsel %vm275_vm4, %v425_v2, %v1179_v33  ;;  %v286_v8 = vsel %vm275_vm4, %v283_v6, %v271_v37  ;;  %v512_v37 = vmul.f32 %v510_v27, %v506_v32 }
 0x148   : > { %328 = vrot.lane.b32.xlu0 %v316_v60, %s945_s11  ;;  %432 = vrot.lane.b32.xlu1 %v427_v7, %s944_s10  ;;  %v339_v60 = vmul.f32 2.0, %v1173_v30 }
 0x14a   : > { %v285_v9 = vpop.permute.xlu1 %284  ;;  %v393_v12 = vpop.permute.xlu0 %392 }
 0x14b   : > { %v287_v11 = vsel %vm275_vm4, %v285_v9, %v272_v39  ;;  %v396_v14 = vsel %vm275_vm4, %v393_v12, %v382_v41  ;;  %v514_v39 = vadd.f32 %v512_v37, %v508_v35 }
 0x14c   : > { %290 = vrot.lane.b32.xlu0 %v286_v8, %s944_s10  ;;  %330 = vrot.lane.b32.xlu1 %v317_v1, %s945_s11 }
 0x14d   : > { %v516_v41 = vsub.f32 0.0, %v514_v39 }
 0x14e   : > { %v395_v16 = vpop.permute.xlu1 %394 }
 0x14f   : > { %v397_v17 = vsel %vm275_vm4, %v395_v16, %v383_v42  ;;  %v517_v42 = vadd.f32 0.5, %v1142_v5  ;;  %v520_v45 = vmul.f32 %v518_v43, %v516_v41  ;;  %v338_v5 = vmul.f32 2.0, %v1162_v23 }
 0x150   : > { %298 = vrot.lane.b32.xlu0 %v286_v8, %s945_s11  ;;  %292 = vrot.lane.b32.xlu1 %v287_v11, %s944_s10  ;;  %v448_v16 = vmul.f32 2.0, %v1166_v26 }
 0x151   : > { %v519_v44 = vmul.f32 %v517_v42, %v515_v40  ;;  %v522_v47 = vsel %vm480_vm5, %v520_v45, 0.0 }
 0x153   : > { %v521_v46 = vsel %vm480_vm5, %v519_v44, 0.0 }
 0x154   : > { %400 = vrot.lane.b32.xlu0 %v396_v14, %s944_s10  ;;  %300 = vrot.lane.b32.xlu1 %v287_v11, %s945_s11  ;;  %v523_v48 = vadd.f32 %v522_v47, %v521_v46 }
 0x158   : > { %408 = vrot.lane.b32.xlu0 %v396_v14, %s945_s11  ;;  %402 = vrot.lane.b32.xlu1 %v397_v17, %s944_s10  ;;  %s843_s10 = sshll.u32 %s946_s23, 4  ;;  %s844_s10 = int_to_ptr.vmem [resolvable:$false] %s843_s10 }
 0x159   : > { %p846_p10 = scmp.lt.s32.totalorder %s1275_s17, %s844_s10 }
 0x15c   : > { %438 = vrot.lane.b32.xlu0 %v426_v63, %s945_s11  ;;  %410 = vrot.lane.b32.xlu1 %v397_v17, %s945_s11 }
 0x160   : > { %440 = vrot.lane.b32.xlu1 %v427_v7, %s945_s11  ;;  %s845_s11 = scalar_lea.vmem %s844_s10, 32 }
 0x161   : > { %p847_p0 = scmp.lt.s32.totalorder %s845_s11, %s839_s9 }
 0x163   : > { %p848_p2 = por %p847_p0, %p846_p10 }
 0x165   : > { %p849_p4 = pnand %p848_p2, %p842_p7 }
 0x184   : > { %524 = vadd.xlane.f32.xlu1 %v523_v48 }
 0x1b2   : > { %v321_v49 = vpop.permute.xlu0 %320 }
 0x1b3   : > { %v326_v10 = vsel %vm251_vm6, %v321_v49, 0.0 }
 0x1b4   : > { %v340_v58 = vadd.f32 %v338_v5, %v326_v10 }
 0x1b6   : > { %v431_v50 = vpop.permute.xlu0 %430  ;;  %v323_v51 = vpop.permute.xlu1 %322 }
 0x1b7   : > { %v327_v0 = vsel %vm251_vm6, %v323_v51, 0.0  ;;  %v436_v20 = vsel %vm251_vm6, %v431_v50, 0.0 }
 0x1b8   : > { %v341_v6 = vadd.f32 %v339_v60, %v327_v0  ;;  %v450_v25 = vadd.f32 %v448_v16, %v436_v20 }
 0x1ba   : > { %v329_v53 = vpop.permute.xlu0 %328  ;;  %v433_v54 = vpop.permute.xlu1 %432 }
 0x1bb   : > { %v334_v57 = vsel %vm252_vm7, %v329_v53, 0.0  ;;  %v437_v27 = vsel %vm251_vm6, %v433_v54, 0.0 }
 0x1bc   : > { %v342_v63 = vadd.f32 %v340_v58, %v334_v57  ;;  %v451_v36 = vadd.f32 %v449_v4, %v437_v27 }
 0x1be   : > { %v291_v55 = vpop.permute.xlu0 %290  ;;  %v331_v56 = vpop.permute.xlu1 %330  ;;  %v346_v11 = vmul.f32 %v342_v63, %v342_v63 }
 0x1bf   : > { %v296_v59 = vsel %vm251_vm6, %v291_v55, 0.0  ;;  %v335_v2 = vsel %vm252_vm7, %v331_v56, 0.0 }
 0x1c0   : > { %v343_v30 = vadd.f32 %v341_v6, %v335_v2 }
 0x1c2   : > { %v299_v61 = vpop.permute.xlu0 %298  ;;  %v293_v62 = vpop.permute.xlu1 %292  ;;  %v347_v22 = vmul.f32 %v343_v30, %v343_v30 }
 0x1c3   : > { %v304_v1 = vsel %vm252_vm7, %v299_v61, 0.0  ;;  %v297_v12 = vsel %vm251_vm6, %v293_v62, 0.0 }
 0x1c4   : > { %v336_v23 = vsub.f32 %v296_v59, %v304_v1 }
 0x1c6   : > { %v344_v7 = vmul.f32 %v336_v23, %v336_v23  ;;  %v401_v8 = vpop.permute.xlu0 %400  ;;  %v301_v9 = vpop.permute.xlu1 %300 }
 0x1c7   : > { %v305_v13 = vsel %vm252_vm7, %v301_v9, 0.0  ;;  %v406_v21 = vsel %vm251_vm6, %v401_v8, 0.0 }
 0x1c8   : > { %v337_v14 = vsub.f32 %v297_v12, %v305_v13  ;;  %v348_v15 = vadd.f32 %v346_v11, %v344_v7 }
 0x1ca   : > { %v345_v17 = vmul.f32 %v337_v14, %v337_v14  ;;  %v409_v18 = vpop.permute.xlu0 %408  ;;  %v403_v19 = vpop.permute.xlu1 %402  ;;  %v350_v24 = vadd.f32 1e-08, %v348_v15 }
 0x1cb   : > { %v414_v3 = vsel %vm252_vm7, %v409_v18, 0.0  ;;  %v407_v37 = vsel %vm251_vm6, %v403_v19, 0.0 }
 0x1cc   : > { %v349_v28 = vadd.f32 %v347_v22, %v345_v17  ;;  %v446_v29 = vsub.f32 %v406_v21, %v414_v3  ;;  %775 = vrsqrt.f32 %v350_v24  ;;  %vm354_vm8 = vcmp.eq.f32.partialorder %v350_v24, inf }
 0x1cd   : > { %v357_v52 = vand.u32 2147483648, %v350_v24  ;;  %vm356_vm10 = vcmp.eq.f32.partialorder %v350_v24, 0.0 }
 0x1ce   : > { %v439_v31 = vpop.permute.xlu0 %438  ;;  %v411_v26 = vpop.permute.xlu1 %410  ;;  %v351_v38 = vadd.f32 1e-08, %v349_v28  ;;  %v454_v39 = vmul.f32 %v446_v29, %v446_v29 }
 0x1cf   : > { %v444_v32 = vsel %vm252_vm7, %v439_v31, 0.0  ;;  %v415_v34 = vsel %vm252_vm7, %v411_v26, 0.0 }
 0x1d0   : > { %v452_v35 = vadd.f32 %v450_v25, %v444_v32  ;;  %v447_v40 = vsub.f32 %v407_v37, %v415_v34  ;;  %777 = vrsqrt.f32 %v351_v38  ;;  %vm361_vm12 = vcmp.eq.f32.partialorder %v351_v38, inf }
 0x1d1   : > { %v364_v63 = vand.u32 2147483648, %v351_v38  ;;  %vm363_vm14 = vcmp.eq.f32.partialorder %v351_v38, 0.0 }
 0x1d2   : > { %v456_v33 = vmul.f32 %v452_v35, %v452_v35  ;;  %v441_v41 = vpop.permute.xlu1 %440  ;;  %v455_v46 = vmul.f32 %v447_v40, %v447_v40 }
 0x1d3   : > { %v445_v42 = vsel %vm252_vm7, %v441_v41, 0.0 }
 0x1d4   : > { %v458_v43 = vadd.f32 %v456_v33, %v454_v39  ;;  %v453_v44 = vadd.f32 %v451_v36, %v445_v42 }
 0x1d6   : > { %v460_v45 = vadd.f32 1e-08, %v458_v43  ;;  %v457_v47 = vmul.f32 %v453_v44, %v453_v44 }
 0x1d8   : > { %779 = vrsqrt.f32 %v460_v45  ;;  %v459_v48 = vadd.f32 %v457_v47, %v455_v46  ;;  %vm464_vm9 = vcmp.eq.f32.partialorder %v460_v45, inf  ;;  %v467_v56 = vand.u32 2147483648, %v460_v45 }
 0x1d9   : > { %v776_v50 = vpop.eup %775  ;;  %vm466_vm11 = vcmp.eq.f32.partialorder %v460_v45, 0.0 }
 0x1da   : > { %v461_v49 = vadd.f32 1e-08, %v459_v48  ;;  %v353_v51 = vmul.f32 %v776_v50, %v350_v24 }
 0x1dc   : > { %781 = vrsqrt.f32 %v461_v49  ;;  %v355_v5 = vsel %vm354_vm8, %v350_v24, %v353_v51  ;;  %vm471_vm13 = vcmp.eq.f32.partialorder %v461_v49, inf  ;;  %v474_v1 = vand.u32 2147483648, %v461_v49 }
 0x1dd   : > { %v778_v53 = vpop.eup %777  ;;  %v358_v59 = vsel %vm356_vm10, %v357_v52, %v355_v5  ;;  %vm473_vm15 = vcmp.eq.f32.partialorder %v461_v49, 0.0 }
 0x1de   : > { %v360_v10 = vmul.f32 %v778_v53, %v351_v38 }
 0x1e0   : > { %v362_v61 = vsel %vm361_vm12, %v351_v38, %v360_v10 }
 0x1e1   : > { %v365_v2 = vsel %vm363_vm14, %v364_v63, %v362_v61 }
 0x1e5   : > { %v780_v54 = vpop.eup %779 }
 0x1e6   : > { %v463_v55 = vmul.f32 %v780_v54, %v460_v45 }
 0x1e8   : > { %v465_v57 = vsel %vm464_vm9, %v460_v45, %v463_v55 }
 0x1e9   : > { %v782_v58 = vpop.eup %781  ;;  %v468_v60 = vsel %vm466_vm11, %v467_v56, %v465_v57 }
 0x1ea   : > { %v470_v62 = vmul.f32 %v782_v58, %v461_v49  ;;  %v476_v0 = vsub.f32 %v358_v59, %v468_v60 }
 0x1ec   : > { %v472_v23 = vsel %vm471_vm13, %v461_v49, %v470_v62  ;;  %v478_v8 = vand.u32 2147483647, %v476_v0 }
 0x1ed   : > { %v475_v6 = vsel %vm473_vm15, %v474_v1, %v472_v23 }
 0x1ee   : > { %v477_v7 = vsub.f32 %v365_v2, %v475_v6  ;;  %v481_v11 = vsel %vm480_vm5, %v478_v8, 0.0 }
 0x1f0   : > { %v479_v9 = vand.u32 2147483647, %v477_v7 }
 0x1f2   : > { %v482_v12 = vsel %vm480_vm5, %v479_v9, 0.0 }
 0x1f3   : > { %v483_v13 = vadd.f32 %v482_v12, %v481_v11 }
 0x1f5   : > { %484 = vadd.xlane.f32.xlu0 %v483_v13 }
 0x20d   : > { %v525_v30 = vpop.xlane.xlu1 %524 }
 0x20e   : > { %v526_v14 = vrot.slane %v525_v30, 4 }
 0x210   : > { %v527_v15 = vadd.f32 %v526_v14, %v525_v30 }
 0x212   : > { %v528_v16 = vrot.slane %v527_v15, 2 }
 0x214   : > { %v529_v20 = vadd.f32 %v528_v16, %v527_v15 }
 0x216   : > { %v530_v22 = vrot.slane %v529_v20, 1 }
 0x218   : > { %v531_v25 = vadd.f32 %v530_v22, %v529_v20 }
 0x27e   : > { %v485_v17 = vpop.xlane.xlu0 %484 }
 0x27f   : > { %v486_v18 = vrot.slane %v485_v17, 4 }
 0x281   : > { %v487_v19 = vadd.f32 %v486_v18, %v485_v17 }
 0x283   : > { %v488_v21 = vrot.slane %v487_v19, 2 }
 0x285   : > { %v489_v3 = vadd.f32 %v488_v21, %v487_v19 }
 0x287   : > { %v490_v4 = vrot.slane %v489_v3, 1 }
 0x289   : > { %v491_v24 = vadd.f32 %v490_v4, %v489_v3 }
 0x28b   : > { %702 = vpush %v491_v24 }
 0x28c   : > { %704 = vpush %v531_v25 }
 0x2bc   : > { %s703_s22 = spop %702 }
 0x2bd   : > { %v533_v27 = vstv %s703_s22  ;;  %s705_s8 = spop %704 }
 0x2be   : > { %534 = vst [vmem:[%s231_s5] sm:$0x1] %v533_v27  ;;  %v535_v28 = vstv %s705_s8 }
 0x2bf   : > { %536 = vst [vmem:[%s237_s20] sm:$0x1] %v535_v28 }
 0x2c0   : > { %852 = shalt.err (!%p849_p4)
}
 0x2c1   : > { %s853_s20 = scalar_lea.hbm %s1273_s19, 16  ;;  %s857_s26 = scalar_lea.hbm %s1344_s2, 32 }
 0x2c2   : > { %p854_p9 = scmp.ne.s32.totalorder %s1273_s19, %s853_s20  ;;  %p858_p5 = scmp.lt.s32.totalorder %s1273_s19, %s1344_s2 }
 0x2c3   : > { %p859_p8 = scmp.lt.s32.totalorder %s857_s26, %s853_s20 }
 0x2c4   : > { %p855_p11 = pnand %p854_p9, %p1355_p1 }
 0x2c5   : > { %p860_p6 = por %p859_p8, %p858_p5 }
 0x2c6   : > { %p856_p3 = pneg %p855_p11 }
 0x2c8   : > { %p861_p13 = pnand %p860_p6, %p856_p3 }
 0x2ca   : > { %864 = shalt.err (!%p861_p13)
}
 0x2cb   : > { %710 = dma.vmem_to_hbm [thread:$0]  (%p1355_p1), %s1275_s17, 16, %s1273_s19, %s538_s7  }
 0x2cc   : > { %s542_s8 = scalar_lea.sflag [#allocation9], %s1124_s6  ;;  %s865_s30 = scalar_lea.vmem %s1268_s29, 16 }
 0x2cd   : > { %p866_p12 = scmp.ne.s32.totalorder %s1268_s29, %s865_s30  ;;  %s947_s16 = smov [#allocation8]  }
 0x2ce   : > { %s869_s9 = sshll.u32 %s947_s16, 4  ;;  %s870_s9 = int_to_ptr.vmem [resolvable:$false] %s869_s9 }
 0x2cf   : > { %p867_p7 = pnand %p866_p12, %p1355_p1  ;;  %s871_s23 = scalar_lea.vmem %s870_s9, 32 }
 0x2d0   : > { %p872_p0 = scmp.lt.s32.totalorder %s1268_s29, %s870_s9  ;;  %p873_p2 = scmp.lt.s32.totalorder %s871_s23, %s865_s30 }
 0x2d1   : > { %p868_p10 = pneg %p867_p7 }
 0x2d2   : > { %p874_p4 = por %p873_p2, %p872_p0 }
 0x2d4   : > { %p875_p9 = pnand %p874_p4, %p868_p10 }
 0x2d6   : > { %878 = shalt.err (!%p875_p9)
}
 0x2d7   : > { %s879_s17 = scalar_lea.hbm %s1280_s27, 16  ;;  %s883_s7 = scalar_lea.hbm %s1345_s3, 32 }
 0x2d8   : > { %p880_p11 = scmp.ne.s32.totalorder %s1280_s27, %s879_s17  ;;  %p884_p8 = scmp.lt.s32.totalorder %s1280_s27, %s1345_s3 }
 0x2d9   : > { %p885_p6 = scmp.lt.s32.totalorder %s883_s7, %s879_s17 }
 0x2da   : > { %p881_p3 = pnand %p880_p11, %p1355_p1 }
 0x2db   : > { %p886_p13 = por %p885_p6, %p884_p8 }
 0x2dc   : > { %p882_p5 = pneg %p881_p3 }
 0x2de   : > { %p887_p12 = pnand %p886_p13, %p882_p5 }
 0x2e0   : > { %890 = shalt.err (!%p887_p12)
}
 0x2e1   : > { %711 = dma.vmem_to_hbm [thread:$0]  (%p1355_p1), %s1268_s29, 16, %s1280_s27, %s542_s8  }
 0x2e2 PF: > { %s579_s20 = sand.u32 1, %s925_s12   ;;  %p1356_p7 = scmp.ne.s32.totalorder %s1351_s25, 0 }
 0x2e3   : > { %p1357_p10 = scmp.ge.s32.totalorder %s937_s15, 2  ;;  %s580_s4 = scalar_lea.sflag [#allocation4], %s579_s20 }
 0x2e5   : > { %p722_p0 = pnand %p1357_p10, %p1356_p7 }
 0x2e7   : > { %p723_p2 = pneg %p722_p0 }
 0x2e9   : > { %916 = dma.done.wait (%p723_p2), %s580_s4, 16  }
 0x2ea   : > { %918 = vsyncadd (%p723_p2), %s580_s4, 4294967280  ;;  %s588_s5 = scalar_lea.sflag [#allocation9], %s579_s20 }
 0x2eb   : > { %920 = dma.done.wait (%p723_p2), %s588_s5, 16  }
 0x2ec   : > { %922 = vsyncadd (%p723_p2), %s588_s5, 4294967280  ;;  %p23_p1 = scmp.ge.s32.totalorder %s993_s18, 4   ;;  %s1358_s12 = smov %s929_s13 }
 0x2ed   : > { %s1359_s13 = smov %s933_s14  ;;  %s1360_s14 = smov %s1005_s21 }
 0x2ee   : > { %s1361_s15 = smov %s993_s18  ;;  %25 = sbr.rel (!%p23_p1) target bundleno = 9 (0x9), region = 103 }
 0x2f3   :  { %592 = vsyncpa [#allocation3], 1 }
 0x2f4   :  { %594 = vsyncpa [#allocation3 + $0x1], 1 }
 0x2f5   :  { %595 = vsyncpa [#allocation6], 1 }
 0x2f6   :  { %597 = vsyncpa [#allocation6 + $0x1], 1 }
 0x2f7   :  { %598 = vsyncpa [#allocation4], 1 }
 0x2f8   :  { %600 = vsyncpa [#allocation4 + $0x1], 1 }
 0x2f9   :  { %601 = vsyncpa [#allocation9], 1 }
 0x2fa   :  { %603 = vsyncpa [#allocation9 + $0x1], 1 }

</bundles_post_ra>
